<compile_context>
chip_gen: v5e
topology: v5e:2x2
jax: 0.10.0
libtpu: 0.0.40
codegen_flags: <defaults>
</compile_context>

<pallas_src>
import functools

import jax
import jax.numpy as jnp
from jax.experimental import pallas as pl
from jax.experimental.pallas import tpu as pltpu

_MIB = 1024 * 1024


def _round_up(x, m):
    return (x + m - 1) // m * m


def _cdiv(a, b):
    return (a + b - 1) // b


def _vmem_capacity_bytes():
    """Trace-time VMEM capacity query; conservative (v7x-sized) fallback."""
    try:
        info = pltpu.get_tpu_info()
        cap = getattr(info, "vmem_capacity_bytes", None)
        if cap:
            return int(cap)
    except Exception:
        pass
    return 64 * _MIB


# ---------------------------------------------------------------------------
# Kernels
# ---------------------------------------------------------------------------
def _ffn_kernel_resident(x_ref, w1_ref, b1_ref, w2_ref, b2_ref, o_ref):
    """Weights fully resident: single pass, no accumulator scratch."""
    h = jnp.dot(x_ref[...], w1_ref[...], preferred_element_type=jnp.float32)
    h = jnp.maximum(h + b1_ref[...].astype(jnp.float32), 0.0)   # bias + ReLU
    # Dropout(p=0.0) == identity.
    out = jnp.dot(h.astype(w2_ref.dtype), w2_ref[...],
                  preferred_element_type=jnp.float32)
    o_ref[...] = (out + b2_ref[...].astype(jnp.float32)).astype(o_ref.dtype)


def _ffn_kernel_chunked(x_ref, w1_ref, b1_ref, w2_ref, b2_ref, o_ref, acc_ref):
    """Hidden dim chunked along grid axis 1; f32 accumulator held in VMEM scratch."""
    h_idx = pl.program_id(1)

    @pl.when(h_idx == 0)
    def _init():
        acc_ref[...] = jnp.zeros_like(acc_ref)

    h = jnp.dot(x_ref[...], w1_ref[...], preferred_element_type=jnp.float32)
    h = jnp.maximum(h + b1_ref[...].astype(jnp.float32), 0.0)   # bias + ReLU (exact per-chunk)
    acc_ref[...] += jnp.dot(h.astype(w2_ref.dtype), w2_ref[...],
                            preferred_element_type=jnp.float32)

    @pl.when(h_idx == pl.num_programs(1) - 1)
    def _finalize():
        o_ref[...] = (acc_ref[...] + b2_ref[...].astype(jnp.float32)).astype(o_ref.dtype)


# ---------------------------------------------------------------------------
# Tiling heuristics
# ---------------------------------------------------------------------------
def _pick_tile_h(hidden, dim, w_bytes, resident_budget, chunk_budget, weight_buf):
    """Return the hidden-dim tile th (divides hidden, multiple of 128 unless th==hidden)."""
    # Fully resident (single hidden tile, single-buffered weights)?
    if 2 * dim * hidden * w_bytes <= resident_budget:
        return hidden

    divisors = [t for t in range(128, hidden, 128) if hidden % t == 0]
    if not divisors:
        # hidden has no 128-multiple divisor (e.g. not a multiple of 128): keep it whole.
        return hidden

    def fits(th):
        return weight_buf * 2 * dim * th * w_bytes <= chunk_budget

    # Prefer th >= 512 (keeps the strided W1 column-slice DMA segments long); largest first.
    big = [t for t in divisors if t >= 512 and fits(t)]
    if big:
        return max(big)
    small = [t for t in divisors if fits(t)]
    if small:
        return max(small)
    # Nothing fits the budget gracefully: take the smallest 128-multiple divisor rather
    # than blowing VMEM with the full matrices.
    return min(divisors)


# ---------------------------------------------------------------------------
# Public wrapper
# ---------------------------------------------------------------------------
@functools.partial(jax.jit, static_argnames=("tile_m", "force_hidden_tile"))
def feed_forward(x, w1, b1, w2, b2, *, tile_m=None, force_hidden_tile=None):
    """x: (B, N, dim) -> (B, N, dim). Weights stored as (in_features, out_features).

    tile_m: optional M-tile override (auto-tuned otherwise).
    force_hidden_tile: test hook forcing a specific hidden chunk size.
    """
    B, N, dim = x.shape
    hidden = w1.shape[1]
    M = B * N

    x_bytes = x.dtype.itemsize
    w_bytes = w1.dtype.itemsize

    # Sublane granule: 8 rows for 4-byte dtypes, 16 for bf16, 32 for int8.
    sublane = max(8, 32 // x_bytes)

    # --- generation-aware VMEM budgets -------------------------------------
    vmem_cap = _vmem_capacity_bytes()
    if vmem_cap >= 100 * _MIB:          # v5e / v6e: 128 MiB VMEM per core
        resident_budget = 96 * _MIB
        chunk_budget = 32 * _MIB
        hard_cap = 112 * _MIB
        weight_buf = 3                  # deeper weight pipeline when chunked
    else:                               # v7x: 64 MiB VMEM per core -> leave headroom
        resident_budget = 22 * _MIB
        chunk_budget = 16 * _MIB
        hard_cap = 52 * _MIB
        weight_buf = 2

    # --- hidden-dim tiling ---------------------------------------------------
    if force_hidden_tile is not None:
        th = int(force_hidden_tile)
    else:
        th = _pick_tile_h(hidden, dim, w_bytes, resident_budget, chunk_budget, weight_buf)
    n_h = _cdiv(hidden, th)
    assert n_h * th == hidden, "hidden tile must divide hidden"
    weights_resident = (n_h == 1)

    # --- M tiling ------------------------------------------------------------
    if tile_m is None:
        if weights_resident:
            tile_m = 256
        else:
            # Weights are re-streamed from HBM once per M tile -> raise arithmetic
            # intensity (2*tm/itemsize flops per weight byte) above the HBM roofline.
            tile_m = 512 if w_bytes >= 4 else 1024
    tile_m = max(int(tile_m), sublane)

    n_tiles = max(_cdiv(M, tile_m), 1)
    if weights_resident and n_tiles == 1 and M > sublane:
        # Give v7x's two TensorCores something to shard on the parallel axis.
        n_tiles = 2
    tm = _round_up(_cdiv(M, n_tiles), sublane)   # padding bounded by ~one sublane granule/tile
    M_pad = n_tiles * tm

    x2d = x.reshape(M, dim)
    if M_pad != M:
        x2d = jnp.pad(x2d, ((0, M_pad - M), (0, 0)))   # padded rows sliced off below
    b1_2d = b1.reshape(1, hidden)
    b2_2d = b2.reshape(1, dim)

    # --- cost estimate (accounts for weight re-streaming when chunked) -------
    weight_bytes_total = (w1.size + b1.size + w2.size + b2.size) * w_bytes
    weight_streams = 1 if weights_resident else n_tiles
    cost = pl.CostEstimate(
        flops=4 * M * dim * hidden,   # two matmuls: 2*M*dim*hidden flops each
        transcendentals=0,
        bytes_accessed=2 * M * dim * x_bytes + weight_streams * weight_bytes_total,
    )

    if weights_resident:
        # Constant-index blocks are fetched once; single-buffer them to halve footprint.
        w_spec = lambda shape: pl.BlockSpec(shape, lambda i: (0, 0),
                                            pipeline_mode=pl.Buffered(1))
        vmem_est = (
            2 * tm * dim * x_bytes                      # x tiles (double-buffered)
            + 2 * tm * dim * x_bytes                    # out tiles
            + (dim * hidden + hidden + hidden * dim + dim) * w_bytes
            + tm * hidden * 4                           # f32 hidden intermediate
        )
        vmem_limit = int(min(max(vmem_est * 3 // 2, 32 * _MIB), hard_cap))

        out2d = pl.pallas_call(
            _ffn_kernel_resident,
            out_shape=jax.ShapeDtypeStruct((M_pad, dim), x.dtype),
            grid_spec=pltpu.PrefetchScalarGridSpec(
                num_scalar_prefetch=0,
                grid=(n_tiles,),
                in_specs=[
                    pl.BlockSpec((tm, dim), lambda i: (i, 0)),     # x tile
                    w_spec((dim, hidden)),                         # W1 (resident)
                    w_spec((1, hidden)),                           # b1
                    w_spec((hidden, dim)),                         # W2 (resident)
                    w_spec((1, dim)),                              # b2
                ],
                out_specs=pl.BlockSpec((tm, dim), lambda i: (i, 0)),
            ),
            compiler_params=pltpu.CompilerParams(
                dimension_semantics=("parallel",),
                vmem_limit_bytes=vmem_limit,
            ),
            cost_estimate=cost,
        )(x2d, w1, b1_2d, w2, b2_2d)
    else:
        wchunk_spec = lambda shape, index_map: pl.BlockSpec(
            shape, index_map, pipeline_mode=pl.Buffered(weight_buf))
        vmem_est = (
            2 * tm * dim * x_bytes                      # x tiles
            + 2 * tm * dim * x_bytes                    # out tiles
            + tm * dim * 4                              # f32 accumulator scratch
            + weight_buf * (dim * th + th + th * dim) * w_bytes   # W1/b1/W2 chunks
            + dim * w_bytes                             # b2 (single-buffered)
            + tm * th * 4                               # f32 hidden-chunk intermediate
        )
        vmem_limit = int(min(max(vmem_est * 3 // 2, 32 * _MIB), hard_cap))

        out2d = pl.pallas_call(
            _ffn_kernel_chunked,
            out_shape=jax.ShapeDtypeStruct((M_pad, dim), x.dtype),
            grid_spec=pltpu.PrefetchScalarGridSpec(
                num_scalar_prefetch=0,
                grid=(n_tiles, n_h),
                in_specs=[
                    pl.BlockSpec((tm, dim), lambda i, h: (i, 0)),              # x tile
                    wchunk_spec((dim, th), lambda i, h: (0, h)),               # W1 chunk
                    wchunk_spec((1, th), lambda i, h: (0, h)),                 # b1 chunk
                    wchunk_spec((th, dim), lambda i, h: (h, 0)),               # W2 chunk
                    pl.BlockSpec((1, dim), lambda i, h: (0, 0),
                                 pipeline_mode=pl.Buffered(1)),                # b2 (constant)
                ],
                out_specs=pl.BlockSpec((tm, dim), lambda i, h: (i, 0)),
                scratch_shapes=[pltpu.VMEM((tm, dim), jnp.float32)],
            ),
            compiler_params=pltpu.CompilerParams(
                dimension_semantics=("parallel", "arbitrary"),
                vmem_limit_bytes=vmem_limit,
            ),
            cost_estimate=cost,
        )(x2d, w1, b1_2d, w2, b2_2d)

    return out2d[:M].reshape(B, N, dim)


# ---------------------------------------------------------------------------
# Params + reference
# ---------------------------------------------------------------------------
def init_params(key, dim, hidden_dim, dtype=jnp.float32):
    """PyTorch nn.Linear default init: U[-1/sqrt(fan_in), 1/sqrt(fan_in)]."""
    k1, k2, k3, k4 = jax.random.split(key, 4)
    bound1 = 1.0 / (dim ** 0.5)
    bound2 = 1.0 / (hidden_dim ** 0.5)
    w1 = jax.random.uniform(k1, (dim, hidden_dim), dtype, -bound1, bound1)
    b1 = jax.random.uniform(k2, (hidden_dim,), dtype, -bound1, bound1)
    w2 = jax.random.uniform(k3, (hidden_dim, dim), dtype, -bound2, bound2)
    b2 = jax.random.uniform(k4, (dim,), dtype, -bound2, bound2)
    return w1, b1, w2, b2


def _reference(x, w1, b1, w2, b2):
    return jnp.maximum(x @ w1 + b1, 0.0) @ w2 + b2


if __name__ == "__main__":
    key = jax.random.PRNGKey(0)
    kx, kp, kx2 = jax.random.split(key, 3)

    # Small but lane-aligned shapes (dim/hidden multiples of 128 keep output stores
    # lane-dense and the MXU column-filled).
    B, N, dim, hidden_dim = 2, 8, 128, 256
    x = jax.random.normal(kx, (B, N, dim), jnp.float32)
    w1, b1, w2, b2 = init_params(kp, dim, hidden_dim)

    # 1) Resident-weight fast path (no accumulator scratch), M split across >=2 tiles.
    out = jax.block_until_ready(feed_forward(x, w1, b1, w2, b2))
    ref = _reference(x, w1, b1, w2, b2)
    assert out.shape == (B, N, dim)
    assert jnp.allclose(out, ref, atol=1e-4, rtol=1e-4), "mismatch (resident path)"

    # 2) Ragged token count (B*N not a multiple of the sublane granule) exercises padding.
    x2 = jax.random.normal(kx2, (3, 5, dim), jnp.float32)
    out2 = jax.block_until_ready(feed_forward(x2, w1, b1, w2, b2))
    ref2 = _reference(x2, w1, b1, w2, b2)
    assert out2.shape == (3, 5, dim)
    assert jnp.allclose(out2, ref2, atol=1e-4, rtol=1e-4), "mismatch (ragged M)"

    # 3) Force the chunked-hidden (accumulator) path to verify the reduction grid axis.
    out3 = jax.block_until_ready(feed_forward(x, w1, b1, w2, b2, force_hidden_tile=128))
    assert jnp.allclose(out3, ref, atol=1e-4, rtol=1e-4), "mismatch (chunked path)"

    print("KERNEL_OK")
</pallas_src>

<mosaic_0001>
module attributes {stable_mosaic.version = 11 : i64} {
  func.func @_ffn_kernel_resident(%arg0: i32, %arg1: memref<8x128xf32, #tpu.memory_space<vmem>>, %arg2: memref<128x256xf32, #tpu.memory_space<vmem>>, %arg3: memref<1x256xf32, #tpu.memory_space<vmem>>, %arg4: memref<256x128xf32, #tpu.memory_space<vmem>>, %arg5: memref<1x128xf32, #tpu.memory_space<vmem>>, %arg6: memref<8x128xf32, #tpu.memory_space<vmem>>) attributes {dimension_semantics = [#tpu.dimension_semantics<parallel>], iteration_bounds = array<i64: 2>, scalar_prefetch = 0 : i64, scratch_operands = 0 : i64, tpu.core_type = #tpu.core_type<tc>, window_params = [{transform_indices = @transform_0, window_bounds = array<i64: 8, 128>}, {pipeline_mode = #tpu.pipeline_mode<synchronous>, transform_indices = @transform_1, window_bounds = array<i64: 128, 256>}, {pipeline_mode = #tpu.pipeline_mode<synchronous>, transform_indices = @transform_2, window_bounds = array<i64: 1, 256>}, {pipeline_mode = #tpu.pipeline_mode<synchronous>, transform_indices = @transform_3, window_bounds = array<i64: 256, 128>}, {pipeline_mode = #tpu.pipeline_mode<synchronous>, transform_indices = @transform_4, window_bounds = array<i64: 1, 128>}, {transform_indices = @transform_5, window_bounds = array<i64: 8, 128>}]} {
    %c0 = arith.constant 0 : index
    %c0_0 = arith.constant 0 : index
    %0 = vector.load %arg1[%c0, %c0_0] : memref<8x128xf32, #tpu.memory_space<vmem>>, vector<8x128xf32>
    %c0_1 = arith.constant 0 : index
    %c0_2 = arith.constant 0 : index
    %1 = vector.load %arg2[%c0_1, %c0_2] : memref<128x256xf32, #tpu.memory_space<vmem>>, vector<128x256xf32>
    %cst = arith.constant dense<0.000000e+00> : vector<8x256xf32>
    %2 = tpu.matmul %0, %1, %cst {dimension_numbers = #tpu.dot_dimension_numbers<[1], [0], [0], [1], [0, 0, 1, 1], [], []>} : vector<8x128xf32>, vector<128x256xf32>, vector<8x256xf32> -> vector<8x256xf32>
    %c0_3 = arith.constant 0 : index
    %c0_4 = arith.constant 0 : index
    %3 = vector.load %arg3[%c0_3, %c0_4] : memref<1x256xf32, #tpu.memory_space<vmem>>, vector<1x256xf32>
    %4 = vector.broadcast %3 : vector<1x256xf32> to vector<8x256xf32>
    %5 = arith.addf %2, %4 : vector<8x256xf32>
    %cst_5 = arith.constant 0.000000e+00 : f32
    %6 = vector.broadcast %cst_5 : f32 to vector<8x256xf32>
    %7 = arith.maximumf %5, %6 : vector<8x256xf32>
    %c0_6 = arith.constant 0 : index
    %c0_7 = arith.constant 0 : index
    %8 = vector.load %arg4[%c0_6, %c0_7] : memref<256x128xf32, #tpu.memory_space<vmem>>, vector<256x128xf32>
    %cst_8 = arith.constant dense<0.000000e+00> : vector<8x128xf32>
    %9 = tpu.matmul %7, %8, %cst_8 {dimension_numbers = #tpu.dot_dimension_numbers<[1], [0], [0], [1], [0, 0, 1, 1], [], []>} : vector<8x256xf32>, vector<256x128xf32>, vector<8x128xf32> -> vector<8x128xf32>
    %c0_9 = arith.constant 0 : index
    %c0_10 = arith.constant 0 : index
    %10 = vector.load %arg5[%c0_9, %c0_10] : memref<1x128xf32, #tpu.memory_space<vmem>>, vector<1x128xf32>
    %11 = vector.broadcast %10 : vector<1x128xf32> to vector<8x128xf32>
    %12 = arith.addf %9, %11 : vector<8x128xf32>
    %c0_11 = arith.constant 0 : index
    %c0_12 = arith.constant 0 : index
    %13 = vector.load %arg6[%c0_11, %c0_12] : memref<8x128xf32, #tpu.memory_space<vmem>>, vector<8x128xf32>
    tpu.vector_store %arg6[%c0_11, %c0_12], %12 {strides = array<i32>} : memref<8x128xf32, #tpu.memory_space<vmem>>, vector<8x128xf32>,
    return
  }
  func.func @transform_0(%arg0: i32) -> (i32, i32) {
    %c0_i32 = arith.constant 0 : i32
    %c0_i32_0 = arith.constant 0 : i32
    return %arg0, %c0_i32 : i32, i32
  }
  func.func @transform_1(%arg0: i32) -> (i32, i32) {
    %c0_i32 = arith.constant 0 : i32
    %c0_i32_0 = arith.constant 0 : i32
    %c0_i32_1 = arith.constant 0 : i32
    return %c0_i32, %c0_i32_0 : i32, i32
  }
  func.func @transform_2(%arg0: i32) -> (i32, i32) {
    %c0_i32 = arith.constant 0 : i32
    %c0_i32_0 = arith.constant 0 : i32
    %c0_i32_1 = arith.constant 0 : i32
    return %c0_i32, %c0_i32_0 : i32, i32
  }
  func.func @transform_3(%arg0: i32) -> (i32, i32) {
    %c0_i32 = arith.constant 0 : i32
    %c0_i32_0 = arith.constant 0 : i32
    %c0_i32_1 = arith.constant 0 : i32
    return %c0_i32, %c0_i32_0 : i32, i32
  }
  func.func @transform_4(%arg0: i32) -> (i32, i32) {
    %c0_i32 = arith.constant 0 : i32
    %c0_i32_0 = arith.constant 0 : i32
    %c0_i32_1 = arith.constant 0 : i32
    return %c0_i32, %c0_i32_0 : i32, i32
  }
  func.func @transform_5(%arg0: i32) -> (i32, i32) {
    %c0_i32 = arith.constant 0 : i32
    %c0_i32_0 = arith.constant 0 : i32
    return %arg0, %c0_i32 : i32, i32
  }
}

</mosaic_0001>

<bundles_post_ra>
// kernel: feed_forward.1
= control target key start
LH: loop header
LB: loop body
LE: loop exit
PB: predicated region body
PF: predicated region fallthrough
CT: control target
= control target key end

     0   :  { %10 = vsyncpa [#allocation3], 0  ;;  %s982_s0 = inlined_call_operand.hbm [shape: f32[16,128], index: 0, kind: input, shape index: {}]   ;;  %s983_s1 = inlined_call_operand.hbm [shape: f32[128,256], index: 1, kind: input, shape index: {}]   ;;  %s984_s2 = inlined_call_operand.vmem [shape: f32[1,256], index: 2, kind: input, shape index: {}]   ;;  %s985_s3 = inlined_call_operand.hbm [shape: f32[256,128], index: 3, kind: input, shape index: {}]   ;;  %s986_s4 = inlined_call_operand.vmem [shape: f32[1,128], index: 4, kind: input, shape index: {}]   ;;  %s987_s5 = inlined_call_operand.hbm [shape: f32[16,128], index: 5, kind: output, shape index: {}]  }
   0x1   :  { %12 = vsyncpa [#allocation3 + $0x1], 0 }
   0x2   :  { %13 = vsyncpa [#allocation6], 0 }
   0x3   :  { %14 = vsyncpa [#allocation4], 0 }
   0x4   :  { %16 = vsyncpa [#allocation4 + $0x1], 0  ;;  %s824_s18 = smov 0   ;;  %s826_s19 = smov 0  }
   0x5   :  { %s828_s20 = smov 0   ;;  %s830_s21 = smov 0  }
   0x6 LB: > { %s174_s24 = sshll.u32 %s983_s1, 4  ;;  %s848_s25 = sadd.s32 4294967295, %s786_s21   ;;  %s786_s21 = sphi %s830_s21, %s998_s21   ;;  %s782_s20 = sphi %s828_s20, %s997_s20   ;;  %s778_s19 = sphi %s826_s19, %s996_s19   ;;  %s774_s18 = sphi %s824_s18, %s995_s18   ;;  %s175_s24 = int_to_ptr.hbm [resolvable:$true] %s174_s24 }
   0x7   : > { %p539_p0 = scmp.ge.s32.totalorder %s786_s21, 1  ;;  %p43_p1 = scmp.eq.s32.totalorder %s848_s25, 0 }
   0x8   : > { %p163_p2 = scmp.lt.s32.totalorder %s786_s21, 3  ;;  %s788_s27 = smov [#allocation5]  }
   0x9   : > { %s176_s28 = sshll.u32 %s788_s27, 4  ;;  %s191_s6 = sshll.u32 %s985_s3, 4  ;;  %s177_s28 = int_to_ptr.vmem [resolvable:$true] %s176_s28  ;;  %s192_s6 = int_to_ptr.hbm [resolvable:$true] %s191_s6 }
   0xa   : > { %p853_p3 = pnand %p539_p0, %p163_p2  ;;  %s789_s7 = smov [#allocation7]  }
   0xb   : > { %s193_s8 = sshll.u32 %s789_s7, 4  ;;  %s790_s9 = smov 256   ;;  %s194_s8 = int_to_ptr.vmem [resolvable:$true] %s193_s8 }
   0xc   : > { %p566_p4 = pneg %p853_p3  ;;  %s791_s10 = smov 16  }
   0xd   : > { %s792_s11 = smov 128   ;;  %s793_s12 = smov 8  }
   0xe   : > { %p567_p6 = pnand %p566_p4, %p43_p1  ;;  %s538_s13 = sadd.s32 4294967294, %s786_s21  }
   0xf   : > { %s867_s14 = sadd.s32 1, %s786_s21   ;;  %s29_s16 = sadd.s32 1, %s782_s20 }
  0x10   : > { %569 = dma.hbm_to_vmem [thread:$0]  (!%p567_p6), %s175_s24, 4096, %s177_s28, [#allocation6], %s790_s9, %s790_s9, %s791_s10  }
  0x11   : > { %572 = dma.hbm_to_vmem [thread:$0]  (!%p567_p6), %s192_s6, 4096, %s194_s8, [#allocation6], %s792_s11, %s792_s11, %s793_s12  }
  0x12   : > { %s26_s15 = ssub.s32 %s786_s21, %s867_s14  ;;  %p36_p8 = scmp.ne.s32.totalorder %s782_s20, %s778_s19 }
  0x13   : > { %p27_p7 = scmp.eq.s32.totalorder %s26_s15, 0  ;;  %p37_p9 = scmp.eq.s32.totalorder %s786_s21, 0 }
  0x14   : > { %p42_p10 = scmp.ne.s32.totalorder %s778_s19, %s774_s18  ;;  %p150_p13 = scmp.eq.s32.totalorder %s848_s25, 1 }
  0x15   : > { %s878_s17 = scalar_select %p27_p7, %s782_s20, %s29_s16  }
  0x16   : > { %p880_p11 = por %p37_p9, %p36_p8  ;;  %p886_p12 = por %p43_p1, %p42_p10 }
  0x17   : > { %p156_p0 = scmp.eq.s32.totalorder %s538_s13, 1  ;;  %p583_p2 = scmp.lt.s32.totalorder %s786_s21, 2 }
  0x18   : > { %s210_s24 = sand.u32 1, %s782_s20   ;;  %p893_p4 = por %p150_p13, %p36_p8 }
  0x19   : > { %p897_p6 = por %p156_p0, %p42_p10  ;;  %s543_s29 = sshll.u32 %s210_s24, 3 }
  0x1a   : > { %s544_s30 = sshll.u32 %s786_s21, 3  ;;  %s214_s9 = scalar_lea.vmem [#allocation2], %s543_s29 }
  0x1b   : > { %s218_s8 = scalar_lea.hbm %s982_s0, %s544_s30  ;;  %s222_s10 = sshll.u32 %s214_s9, 4  ;;  %s223_s10 = int_to_ptr.vmem [resolvable:$true] %s222_s10 }
  0x1c   : > { %s220_s11 = sshll.u32 %s218_s8, 4  ;;  %p907_p7 = pnand %p583_p2, %p880_p11  ;;  %s221_s11 = int_to_ptr.hbm [resolvable:$true] %s220_s11 }
  0x1d   : > { %s211_s13 = scalar_lea.sflag [#allocation3], %s210_s24  ;;  %s686_s15 = sshra.s32 %s221_s11, 4  ;;  %s687_s15 = int_to_ptr.hbm [resolvable:$true] %s686_s15 }
  0x1e   : > { %s688_s16 = scalar_lea.hbm %s687_s15, 8  ;;  %p690_p9 = pneg %p907_p7 }
  0x1f   : > { %p689_p8 = scmp.ne.s32.totalorder %s687_s15, %s688_s16  ;;  %s693_s6 = scalar_lea.hbm %s982_s0, 16 }
  0x20   : > { %p694_p11 = scmp.lt.s32.totalorder %s687_s15, %s982_s0  ;;  %p695_p0 = scmp.lt.s32.totalorder %s693_s6, %s688_s16 }
  0x21   : > { %p691_p10 = pnand %p690_p9, %p689_p8 }
  0x22   : > { %p696_p2 = por %p695_p0, %p694_p11 }
  0x23   : > { %p692_p13 = pneg %p691_p10 }
  0x25   : > { %p697_p5 = pnand %p696_p2, %p692_p13 }
  0x27   : > { %700 = shalt.err (!%p697_p5)
}
  0x28   : > { %576 = dma.hbm_to_vmem [thread:$0]  (!%p907_p7), %s221_s11, 128, %s223_s10, %s211_s13  }
  0x29   : > { %231 = sbr.rel (%p853_p3) target bundleno = 350 (0x15e), region = 40  ;;  %s924_s24 = sand.u32 (!%p853_p3), 1, %s778_s19  }
  0x2a   : > { %s546_s8 = sshll.u32 (!%p853_p3), %s924_s24, 3  ;;  %s234_s9 = scalar_lea.sflag (!%p853_p3), [#allocation3], %s924_s24 }
  0x2b   : > { %s930_s15 = scalar_lea.vmem (!%p853_p3), [#allocation2], %s546_s8 }
  0x2e   : > { %761 = dma.done.wait (%p886_p12), %s234_s9, 128  }
  0x2f   : > { %763 = vsyncadd (%p886_p12), %s234_s9, 4294967168 }
  0x30   : > { %765 = dma.done.wait (%p43_p1), [#allocation6], 8192  }
  0x31   : > { %767 = vsyncadd (%p43_p1), [#allocation6], 4294959104  ;;  %v306_v0 = vld [vmem:[#allocation5 + $0xf0] sm:$0xff]  ;;  %v304_v1 = vld [vmem:[#allocation5 + $0xe0] sm:$0xff]  ;;  %s551_s10 = sshll.u32 %s848_s25, 3  ;;  %s274_s30 = scalar_lea.vmem [#allocation8], %s546_s8 }
  0x32   : > { %v307_v2 = vld [vmem:[#allocation5 + $0xf8] sm:$0xff]  ;;  %314 = vmatpush.msra.mxu0 %v306_v0  ;;  %v305_v3 = vld [vmem:[#allocation5 + $0xe8] sm:$0xff]  ;;  %v302_v4 = vld [vmem:[#allocation5 + $0xd0] sm:$0xff]  ;;  %s444_s29 = scalar_lea.hbm %s987_s5, %s551_s10  ;;  %s446_s6 = sshll.u32 %s274_s30, 4  ;;  %s447_s6 = int_to_ptr.vmem [resolvable:$true] %s446_s6 }
  0x33   : > { %334 = vmatpush.msra.mxu1 %v307_v2  ;;  %v303_v5 = vld [vmem:[#allocation5 + $0xd8] sm:$0xff]  ;;  %v300_v6 = vld [vmem:[#allocation5 + $0xc0] sm:$0xff]  ;;  %v301_v7 = vld [vmem:[#allocation5 + $0xc8] sm:$0xff]  ;;  %s448_s7 = sshll.u32 %s444_s29, 4  ;;  %s434_s25 = scalar_lea.sflag [#allocation4], %s924_s24  ;;  %s449_s7 = int_to_ptr.hbm [resolvable:$true] %s448_s7 }
  0x34   : > { %315 = vmatpush.msra.mxu0 %v304_v1  ;;  %v298_v8 = vld [vmem:[#allocation5 + $0xb0] sm:$0xff]  ;;  %v299_v9 = vld [vmem:[#allocation5 + $0xb8] sm:$0xff]  ;;  %v296_v10 = vld [vmem:[#allocation5 + $0xa0] sm:$0xff]  ;;  %s730_s22 = sshra.s32 %s449_s7, 4  ;;  %s736_s23 = scalar_lea.hbm %s987_s5, 16  ;;  %s731_s22 = int_to_ptr.hbm [resolvable:$true] %s730_s22 }
  0x35   : > { %335 = vmatpush.msra.mxu1 %v305_v3  ;;  %v297_v11 = vld [vmem:[#allocation5 + $0xa8] sm:$0xff]  ;;  %v294_v12 = vld [vmem:[#allocation5 + $0x90] sm:$0xff]  ;;  %v295_v13 = vld [vmem:[#allocation5 + $0x98] sm:$0xff]  ;;  %s732_s9 = scalar_lea.hbm %s731_s22, 8  ;;  %p737_p12 = scmp.lt.s32.totalorder %s731_s22, %s987_s5 }
  0x36   : > { %316 = vmatpush.msra.mxu0 %v302_v4  ;;  %v371_v14 = vld [vmem:[#allocation7 + $0x78] sm:$0xff]  ;;  %v370_v15 = vld [vmem:[#allocation7 + $0x70] sm:$0xff]  ;;  %v292_v17 = vld [vmem:[#allocation5 + $0x80] sm:$0xff]  ;;  %p733_p1 = scmp.ne.s32.totalorder %s731_s22, %s732_s9  ;;  %p738_p7 = scmp.lt.s32.totalorder %s736_s23, %s732_s9 }
  0x37   : > { %336 = vmatpush.msra.mxu1 %v303_v5  ;;  %v387_v16 = vld [vmem:[#allocation7 + $0xf8] sm:$0xff]  ;;  %v293_v18 = vld [vmem:[#allocation5 + $0x88] sm:$0xff]  ;;  %392 = vmatpush.msra.mxu2 %v371_v14  ;;  %v386_v19 = vld [vmem:[#allocation7 + $0xf0] sm:$0xff] }
  0x38   : > { %317 = vmatpush.msra.mxu0 %v300_v6  ;;  %412 = vmatpush.msra.mxu3 %v387_v16  ;;  %v369_v20 = vld [vmem:[#allocation7 + $0x68] sm:$0xff]  ;;  %v290_v22 = vld [vmem:[#allocation5 + $0x70] sm:$0xff]  ;;  %v291_v23 = vld [vmem:[#allocation5 + $0x78] sm:$0xff]  ;;  %p734_p3 = pnand %p733_p1, %p893_p4  ;;  %p739_p8 = por %p738_p7, %p737_p12 }
  0x39   : > { %337 = vmatpush.msra.mxu1 %v301_v7  ;;  %v385_v21 = vld [vmem:[#allocation7 + $0xe8] sm:$0xff]  ;;  %393 = vmatpush.msra.mxu2 %v370_v15  ;;  %v368_v24 = vld [vmem:[#allocation7 + $0x60] sm:$0xff]  ;;  %v367_v28 = vld [vmem:[#allocation7 + $0x58] sm:$0xff] }
  0x3a   : > { %318 = vmatpush.msra.mxu0 %v298_v8  ;;  %413 = vmatpush.msra.mxu3 %v386_v19  ;;  %v384_v25 = vld [vmem:[#allocation7 + $0xe0] sm:$0xff]  ;;  %v289_v27 = vld [vmem:[#allocation5 + $0x68] sm:$0xff]  ;;  %v383_v29 = vld [vmem:[#allocation7 + $0xd8] sm:$0xff]  ;;  %p735_p5 = pneg %p734_p3 }
  0x3b   : > { %338 = vmatpush.msra.mxu1 %v299_v9  ;;  %v288_v26 = vld [vmem:[#allocation5 + $0x60] sm:$0xff]  ;;  %394 = vmatpush.msra.mxu2 %v369_v20  ;;  %v286_v30 = vld [vmem:[#allocation5 + $0x50] sm:$0xff]  ;;  %v287_v31 = vld [vmem:[#allocation5 + $0x58] sm:$0xff] }
  0x3c   : > { %319 = vmatpush.msra.mxu0 %v296_v10  ;;  %414 = vmatpush.msra.mxu3 %v385_v21  ;;  %v366_v32 = vld [vmem:[#allocation7 + $0x50] sm:$0xff]  ;;  %v284_v34 = vld [vmem:[#allocation5 + $0x40] sm:$0xff]  ;;  %v285_v35 = vld [vmem:[#allocation5 + $0x48] sm:$0xff]  ;;  %p740_p9 = pnand %p739_p8, %p735_p5 }
  0x3d   : > { %339 = vmatpush.msra.mxu1 %v297_v11  ;;  %395 = vmatpush.msra.mxu2 %v368_v24  ;;  %v382_v33 = vld [vmem:[#allocation7 + $0xd0] sm:$0xff]  ;;  %v365_v36 = vld [vmem:[#allocation7 + $0x48] sm:$0xff]  ;;  %v283_v39 = vld [vmem:[#allocation5 + $0x38] sm:$0xff] }
  0x3e   : > { %320 = vmatpush.msra.mxu0 %v294_v12  ;;  %415 = vmatpush.msra.mxu3 %v384_v25  ;;  %v381_v37 = vld [vmem:[#allocation7 + $0xc8] sm:$0xff]  ;;  %v282_v38 = vld [vmem:[#allocation5 + $0x30] sm:$0xff]  ;;  %v364_v40 = vld [vmem:[#allocation7 + $0x40] sm:$0xff] }
  0x3f   : > { %340 = vmatpush.msra.mxu1 %v295_v13  ;;  %396 = vmatpush.msra.mxu2 %v367_v28  ;;  %v380_v41 = vld [vmem:[#allocation7 + $0xc0] sm:$0xff]  ;;  %v281_v43 = vld [vmem:[#allocation5 + $0x28] sm:$0xff]  ;;  %v363_v44 = vld [vmem:[#allocation7 + $0x38] sm:$0xff] }
  0x40   : > { %321 = vmatpush.msra.mxu0 %v292_v17  ;;  %416 = vmatpush.msra.mxu3 %v383_v29  ;;  %v280_v42 = vld [vmem:[#allocation5 + $0x20] sm:$0xff]  ;;  %v379_v45 = vld [vmem:[#allocation7 + $0xb8] sm:$0xff]  ;;  %v278_v46 = vld [vmem:[#allocation5 + $0x10] sm:$0xff] }
  0x41   : > { %341 = vmatpush.msra.mxu1 %v293_v18  ;;  %397 = vmatpush.msra.mxu2 %v366_v32  ;;  %v279_v47 = vld [vmem:[#allocation5 + $0x18] sm:$0xff]  ;;  %v362_v48 = vld [vmem:[#allocation7 + $0x30] sm:$0xff]  ;;  %v276_v50 = vld [vmem:[#allocation5] sm:$0xff] }
  0x42   : > { %322 = vmatpush.msra.mxu0 %v290_v22  ;;  %417 = vmatpush.msra.mxu3 %v382_v33  ;;  %v378_v49 = vld [vmem:[#allocation7 + $0xb0] sm:$0xff]  ;;  %v277_v51 = vld [vmem:[#allocation5 + $0x8] sm:$0xff]  ;;  %v360_v55 = vld [vmem:[#allocation7 + $0x20] sm:$0xff] }
  0x43   : > { %342 = vmatpush.msra.mxu1 %v291_v23  ;;  %398 = vmatpush.msra.mxu2 %v365_v36  ;;  %v275_v52 = vld [vmem:[%s930_s15] sm:$0xff]  ;;  %v361_v53 = vld [vmem:[#allocation7 + $0x28] sm:$0xff]  ;;  %v376_v56 = vld [vmem:[#allocation7 + $0xa0] sm:$0xff] }
  0x44   : > { %323 = vmatpush.msra.mxu0 %v288_v26  ;;  %418 = vmatpush.msra.mxu3 %v381_v37  ;;  %v377_v54 = vld [vmem:[#allocation7 + $0xa8] sm:$0xff]  ;;  %v359_v57 = vld [vmem:[#allocation7 + $0x18] sm:$0xff]  ;;  %v358_v58 = vld [vmem:[#allocation7 + $0x10] sm:$0xff] }
  0x45   : > { %343 = vmatpush.msra.mxu1 %v289_v27  ;;  %399 = vmatpush.msra.mxu2 %v364_v40  ;;  %v375_v59 = vld [vmem:[#allocation7 + $0x98] sm:$0xff]  ;;  %v357_v60 = vld [vmem:[#allocation7 + $0x8] sm:$0xff]  ;;  %v374_v61 = vld [vmem:[#allocation7 + $0x90] sm:$0xff] }
  0x46   : > { %324 = vmatpush.msra.mxu0 %v286_v30  ;;  %419 = vmatpush.msra.mxu3 %v380_v41  ;;  %v356_v62 = vld [vmem:[#allocation7] sm:$0xff]  ;;  %v373_v63 = vld [vmem:[#allocation7 + $0x88] sm:$0xff]  ;;  %v308_v1 = vld [vmem:[%s984_s2] sm:$0x3] }
  0x47   : > { %344 = vmatpush.msra.mxu1 %v287_v31  ;;  %400 = vmatpush.msra.mxu2 %v363_v44  ;;  %v372_v0 = vld [vmem:[#allocation7 + $0x80] sm:$0xff]  ;;  %v310_v2 = vperm.slane %v308_v1, 0  ;;  %v311_v3 = vperm.slane %v308_v1, 1  ;;  %v625_v10 = vld [vmem:[%s986_s4] ss:$0 sm:$0xff] }
  0x48   : > { %325 = vmatpush.msra.mxu0 %v284_v34  ;;  %420 = vmatpush.msra.mxu3 %v379_v45 }
  0x49   : > { %345 = vmatpush.msra.mxu1 %v285_v35  ;;  %401 = vmatpush.msra.mxu2 %v362_v48 }
  0x4a   : > { %326 = vmatpush.msra.mxu0 %v282_v38  ;;  %421 = vmatpush.msra.mxu3 %v378_v49 }
  0x4b   : > { %346 = vmatpush.msra.mxu1 %v283_v39  ;;  %402 = vmatpush.msra.mxu2 %v361_v53 }
  0x4c   : > { %327 = vmatpush.msra.mxu0 %v280_v42  ;;  %422 = vmatpush.msra.mxu3 %v377_v54 }
  0x4d   : > { %347 = vmatpush.msra.mxu1 %v281_v43  ;;  %403 = vmatpush.msra.mxu2 %v360_v55 }
  0x4e   : > { %328 = vmatpush.msra.mxu0 %v278_v46  ;;  %423 = vmatpush.msra.mxu3 %v376_v56 }
  0x4f   : > { %348 = vmatpush.msra.mxu1 %v279_v47  ;;  %404 = vmatpush.msra.mxu2 %v359_v57 }
  0x50   : > { %329 = vmatpush.msra.mxu0 %v276_v50  ;;  %424 = vmatpush.msra.mxu3 %v375_v59 }
  0x51   : > { %349 = vmatpush.msra.mxu1 %v277_v51  ;;  %330 = vmatmul.f32.vlgmr.msra.gmra.mxu0 %v275_v52 }
  0x52   : > { %350 = vmatmul.f32.vlgmr.msra.gmra.mxu1 %v275_v52  ;;  %405 = vmatpush.msra.mxu2 %v358_v58 }
  0x53   : > { %425 = vmatpush.msra.mxu3 %v374_v61 }
  0x54   : > { %406 = vmatpush.msra.mxu2 %v357_v60 }
  0x55   : > { %426 = vmatpush.msra.mxu3 %v373_v63 }
  0x56   : > { %407 = vmatpush.msra.mxu2 %v356_v62 }
  0x57   : > { %427 = vmatpush.msra.mxu3 %v372_v0 }
  0xce   : > { %v331_v4 = vpop.f32.mrf.mxu0 }
  0xcf   : > { %v351_v5 = vpop.f32.mrf.mxu1  ;;  %v332_v6 = vadd.f32 %v331_v4, %v310_v2 }
  0xd0   : > { %v352_v7 = vadd.f32 %v351_v5, %v311_v3 }
  0xd1   : > { %v354_v8 = vmax.f32 %v332_v6, 0.0 }
  0xd2   : > { %v355_v9 = vmax.f32 %v352_v7, 0.0 }
  0xd3   : > { %408 = vmatmul.f32.vlgmr.msra.gmra.mxu2 %v354_v8 }
  0xd4   : > { %428 = vmatmul.f32.vlgmr.msra.gmra.mxu3 %v355_v9 }
 0x156   : > { %v409_v11 = vpop.f32.mrf.mxu2 }
 0x157   : > { %v429_v12 = vpop.f32.mrf.mxu3  ;;  %v410_v13 = vadd.f32 %v625_v10, %v409_v11 }
 0x159   : > { %v430_v14 = vadd.f32 %v429_v12, %v410_v13 }
 0x15b   : > { %432 = vst [vmem:[%s274_s30] sm:$0xff] %v430_v14 }
 0x15c   : > { %743 = shalt.err (!%p740_p9)
}
 0x15d   : > { %564 = dma.vmem_to_hbm [thread:$0]  (%p893_p4), %s447_s6, 128, %s449_s7, %s434_s25  }
 0x15e PF: > { %s460_s24 = sand.u32 1, %s774_s18   ;;  %p994_p10 = scmp.ge.s32.totalorder %s786_s21, 2 }
 0x15f   : > { %s461_s11 = scalar_lea.sflag [#allocation4], %s460_s24 }
 0x160   : > { %p578_p13 = pnand %p994_p10, %p897_p6 }
 0x162   : > { %p579_p11 = pneg %p578_p13 }
 0x164   : > { %769 = dma.done.wait (%p579_p11), %s461_s11, 128  }
 0x165   : > { %771 = vsyncadd (%p579_p11), %s461_s11, 4294967168  ;;  %p19_p0 = scmp.ge.s32.totalorder %s867_s14, 4   ;;  %s995_s18 = smov %s778_s19 }
 0x166   : > { %s996_s19 = smov %s782_s20  ;;  %s997_s20 = smov %s878_s17 }
 0x167   : > { %s998_s21 = smov %s867_s14  ;;  %21 = sbr.rel (!%p19_p0) target bundleno = 6 (0x6), region = 93 }
 0x16c   :  { %467 = vsyncpa [#allocation3], 1 }
 0x16d   :  { %469 = vsyncpa [#allocation3 + $0x1], 1 }
 0x16e   :  { %470 = vsyncpa [#allocation6], 1 }
 0x16f   :  { %471 = vsyncpa [#allocation4], 1 }
 0x170   :  { %473 = vsyncpa [#allocation4 + $0x1], 1 }

</bundles_post_ra>
